<compile_context>
chip_gen: v5e
topology: v5e:2x2
jax: 0.10.0
libtpu: 0.0.40
codegen_flags: <defaults>
</compile_context>

<pallas_src>
import jax
import jax.numpy as jnp
from jax.experimental import pallas as pl
from jax.experimental.pallas import tpu as pltpu


def _round_up(x, m):
    return ((x + m - 1) // m) * m


# ----------------------------------------------------------------------------
# Pallas kernel: fused 4-layer MLP autoencoder for one batch tile.
#   x_ref  : (TB, 784)  f32   (cast to bf16 in-kernel)
#   w*_ref : bf16 weights,  b*_ref : f32 biases (1, H)
#   out_ref: (TB, 784)  bf16
# ----------------------------------------------------------------------------
def _autoencoder_kernel(
    x_ref,
    w1_ref, b1_ref,   # (784, H1P), (1, H1P)
    w2_ref, b2_ref,   # (H1P, LATP), (1, LATP)
    w3_ref, b3_ref,   # (LATP, H1P), (1, H1P)
    w4_ref, b4_ref,   # (H1P, 784),  (1, 784)
    out_ref,
):
    # In-kernel bf16 cast (VPU) avoids a separate HBM pre-pass for the cast.
    x = x_ref[...].astype(jnp.bfloat16)

    # Encoder (bf16 MXU operands, f32 accumulation; elementwise math in f32).
    h1 = jnp.dot(x, w1_ref[...], preferred_element_type=jnp.float32) + b1_ref[...]
    h1 = jnp.maximum(h1, 0.0).astype(jnp.bfloat16)

    z = jnp.dot(h1, w2_ref[...], preferred_element_type=jnp.float32) + b2_ref[...]
    z = jnp.maximum(z, 0.0).astype(jnp.bfloat16)

    # Decoder
    h2 = jnp.dot(z, w3_ref[...], preferred_element_type=jnp.float32) + b3_ref[...]
    h2 = jnp.maximum(h2, 0.0).astype(jnp.bfloat16)

    y = jnp.dot(h2, w4_ref[...], preferred_element_type=jnp.float32) + b4_ref[...]

    # bf16 sigmoid (EUP); bf16 store halves output HBM traffic.
    out_ref[...] = jax.nn.sigmoid(y.astype(jnp.bfloat16))


def _pad2d(a, rows, cols):
    r, c = a.shape
    if r == rows and c == cols:
        return a
    return jnp.zeros((rows, cols), a.dtype).at[:r, :c].set(a)


def _choose_batch_tiling(n):
    """Pick (tile_rows, padded_rows): tile <= 1024, multiple of 16, and >=2
    grid steps whenever the batch is large enough (v7x megacore)."""
    np16 = _round_up(max(n, 1), 16)
    if np16 <= 16:
        tb = np16                                   # tiny batch: one tile
    else:
        tb = min(1024, _round_up(-(-np16 // 2), 16))  # at least 2 steps
    np_pad = _round_up(np16, tb)
    return tb, np_pad


# ----------------------------------------------------------------------------
# Wrapper: flatten, tile the batch, call the fused kernel.
# ----------------------------------------------------------------------------
@jax.jit
def mnist_autoencoder_forward(x_nchw, params):
    """x_nchw: (N, 1, 28, 28) float32 -> (N, 1, 28, 28) bfloat16 (sigmoid)."""
    n, c, h, w = x_nchw.shape
    d = c * h * w                                   # 784 (kept unpadded; legal
                                                    # as a full-last-dim block)
    tb, np_pad = _choose_batch_tiling(n)
    grid = (np_pad // tb,)

    w1, b1, w2, b2, w3, b3, w4, b4 = params
    h1d, lat = w1.shape[1], w2.shape[1]
    h1p = _round_up(h1d, 128)                       # lane-align hidden
    latp = _round_up(lat, 128)                      # lane-align latent (32->128)

    # Flatten is free (contiguous); pad rows only if batch isn't tile-aligned.
    x_flat = x_nchw.reshape(n, d).astype(jnp.float32)
    if np_pad != n:
        x_flat = jnp.pad(x_flat, ((0, np_pad - n), (0, 0)))

    # Zero-padded weights (identical math: padded lanes stay 0 through ReLU,
    # padded weight rows contribute 0). Tiny one-time cost.
    w1p = _pad2d(w1.astype(jnp.float32), d, h1p).astype(jnp.bfloat16)
    b1p = _pad2d(b1.astype(jnp.float32), 1, h1p)
    w2p = _pad2d(w2.astype(jnp.float32), h1p, latp).astype(jnp.bfloat16)
    b2p = _pad2d(b2.astype(jnp.float32), 1, latp)
    w3p = _pad2d(w3.astype(jnp.float32), latp, h1p).astype(jnp.bfloat16)
    b3p = _pad2d(b3.astype(jnp.float32), 1, h1p)
    w4p = _pad2d(w4.astype(jnp.float32), h1p, d).astype(jnp.bfloat16)
    b4p = b4.astype(jnp.float32).reshape(1, d)

    # Weights/biases: full-array blocks with constant index maps -> stay
    # VMEM-resident across grid steps (no re-DMA).
    def resident(arr):
        return pl.BlockSpec(arr.shape, lambda i: (0, 0))

    out_pad = pl.pallas_call(
        _autoencoder_kernel,
        out_shape=jax.ShapeDtypeStruct((np_pad, d), jnp.bfloat16),
        grid=grid,
        in_specs=[
            pl.BlockSpec((tb, d), lambda i: (i, 0)),    # x tile streams (f32)
            resident(w1p), resident(b1p),
            resident(w2p), resident(b2p),
            resident(w3p), resident(b3p),
            resident(w4p), resident(b4p),
        ],
        out_specs=pl.BlockSpec((tb, d), lambda i: (i, 0)),
        compiler_params=pltpu.CompilerParams(
            dimension_semantics=("parallel",),
            vmem_limit_bytes=32 << 20,
        ),
    )(x_flat, w1p, b1p, w2p, b2p, w3p, b3p, w4p, b4p)

    # Row slice is a no-op when the batch was already tile-aligned; reshape is
    # free. Output stays bf16 (cast to f32 in the caller only if needed).
    return out_pad[:n].reshape(n, c, h, w)


# ----------------------------------------------------------------------------
# Deterministic parameter init (PyTorch nn.Linear-style uniform(+-1/sqrt(fan_in)))
# ----------------------------------------------------------------------------
def init_params(key, d_in, h1, latent):
    def linear(key, fan_in, fan_out):
        kw, kb = jax.random.split(key)
        bound = 1.0 / jnp.sqrt(fan_in)
        w = jax.random.uniform(kw, (fan_in, fan_out), jnp.float32, -bound, bound)
        b = jax.random.uniform(kb, (1, fan_out), jnp.float32, -bound, bound)
        return w, b

    k1, k2, k3, k4 = jax.random.split(key, 4)
    w1, b1 = linear(k1, d_in, h1)
    w2, b2 = linear(k2, h1, latent)
    w3, b3 = linear(k3, latent, h1)
    w4, b4 = linear(k4, h1, d_in)
    return (w1, b1, w2, b2, w3, b3, w4, b4)


if __name__ == "__main__":
    key = jax.random.PRNGKey(0)
    k_x, k_p = jax.random.split(key)

    # Synthetic config for the search-space autoencoder.
    config = {"hidden": 128, "latent": 32}

    batch, channels, height, width = 2, 1, 28, 28  # MNIST NCHW
    x = jax.random.uniform(k_x, (batch, channels, height, width), jnp.float32)

    params = init_params(k_p, channels * height * width,
                         config["hidden"], config["latent"])

    out = mnist_autoencoder_forward(x, params)
    out = jax.block_until_ready(out)

    assert out.shape == (batch, channels, height, width)
    out_f32 = out.astype(jnp.float32)
    assert bool(jnp.all(jnp.isfinite(out_f32)))
    assert bool(jnp.all((out_f32 >= 0.0) & (out_f32 <= 1.0)))  # sigmoid range
    print("KERNEL_OK")
</pallas_src>

<mosaic_0001>
module attributes {stable_mosaic.version = 11 : i64} {
  func.func @_autoencoder_kernel(%arg0: i32, %arg1: memref<16x784xf32, #tpu.memory_space<vmem>>, %arg2: memref<784x128xbf16, #tpu.memory_space<vmem>>, %arg3: memref<1x128xf32, #tpu.memory_space<vmem>>, %arg4: memref<128x128xbf16, #tpu.memory_space<vmem>>, %arg5: memref<1x128xf32, #tpu.memory_space<vmem>>, %arg6: memref<128x128xbf16, #tpu.memory_space<vmem>>, %arg7: memref<1x128xf32, #tpu.memory_space<vmem>>, %arg8: memref<128x784xbf16, #tpu.memory_space<vmem>>, %arg9: memref<1x784xf32, #tpu.memory_space<vmem>>, %arg10: memref<16x784xbf16, #tpu.memory_space<vmem>>) attributes {dimension_semantics = [#tpu.dimension_semantics<parallel>], iteration_bounds = array<i64: 1>, scalar_prefetch = 0 : i64, scratch_operands = 0 : i64, tpu.core_type = #tpu.core_type<tc>, window_params = [{transform_indices = @transform_0, window_bounds = array<i64: 16, 784>}, {pipeline_mode = #tpu.pipeline_mode<synchronous>, transform_indices = @transform_1, window_bounds = array<i64: 784, 128>}, {pipeline_mode = #tpu.pipeline_mode<synchronous>, transform_indices = @transform_2, window_bounds = array<i64: 1, 128>}, {pipeline_mode = #tpu.pipeline_mode<synchronous>, transform_indices = @transform_3, window_bounds = array<i64: 128, 128>}, {pipeline_mode = #tpu.pipeline_mode<synchronous>, transform_indices = @transform_4, window_bounds = array<i64: 1, 128>}, {pipeline_mode = #tpu.pipeline_mode<synchronous>, transform_indices = @transform_5, window_bounds = array<i64: 128, 128>}, {pipeline_mode = #tpu.pipeline_mode<synchronous>, transform_indices = @transform_6, window_bounds = array<i64: 1, 128>}, {pipeline_mode = #tpu.pipeline_mode<synchronous>, transform_indices = @transform_7, window_bounds = array<i64: 128, 784>}, {pipeline_mode = #tpu.pipeline_mode<synchronous>, transform_indices = @transform_8, window_bounds = array<i64: 1, 784>}, {transform_indices = @transform_9, window_bounds = array<i64: 16, 784>}]} {
    %c0 = arith.constant 0 : index
    %c0_0 = arith.constant 0 : index
    %0 = vector.load %arg1[%c0, %c0_0] : memref<16x784xf32, #tpu.memory_space<vmem>>, vector<16x784xf32>
    %1 = arith.truncf %0 : vector<16x784xf32> to vector<16x784xbf16>
    %c0_1 = arith.constant 0 : index
    %c0_2 = arith.constant 0 : index
    %2 = vector.load %arg2[%c0_1, %c0_2] : memref<784x128xbf16, #tpu.memory_space<vmem>>, vector<784x128xbf16>
    %cst = arith.constant dense<0.000000e+00> : vector<16x128xf32>
    %3 = tpu.matmul %1, %2, %cst {dimension_numbers = #tpu.dot_dimension_numbers<[1], [0], [0], [1], [0, 0, 1, 1], [], []>} : vector<16x784xbf16>, vector<784x128xbf16>, vector<16x128xf32> -> vector<16x128xf32>
    %c0_3 = arith.constant 0 : index
    %c0_4 = arith.constant 0 : index
    %4 = vector.load %arg3[%c0_3, %c0_4] : memref<1x128xf32, #tpu.memory_space<vmem>>, vector<1x128xf32>
    %5 = vector.broadcast %4 : vector<1x128xf32> to vector<16x128xf32>
    %6 = arith.addf %3, %5 : vector<16x128xf32>
    %cst_5 = arith.constant 0.000000e+00 : f32
    %7 = vector.broadcast %cst_5 : f32 to vector<16x128xf32>
    %8 = arith.maximumf %6, %7 : vector<16x128xf32>
    %9 = arith.truncf %8 : vector<16x128xf32> to vector<16x128xbf16>
    %c0_6 = arith.constant 0 : index
    %c0_7 = arith.constant 0 : index
    %10 = vector.load %arg4[%c0_6, %c0_7] : memref<128x128xbf16, #tpu.memory_space<vmem>>, vector<128x128xbf16>
    %cst_8 = arith.constant dense<0.000000e+00> : vector<16x128xf32>
    %11 = tpu.matmul %9, %10, %cst_8 {dimension_numbers = #tpu.dot_dimension_numbers<[1], [0], [0], [1], [0, 0, 1, 1], [], []>} : vector<16x128xbf16>, vector<128x128xbf16>, vector<16x128xf32> -> vector<16x128xf32>
    %c0_9 = arith.constant 0 : index
    %c0_10 = arith.constant 0 : index
    %12 = vector.load %arg5[%c0_9, %c0_10] : memref<1x128xf32, #tpu.memory_space<vmem>>, vector<1x128xf32>
    %13 = vector.broadcast %12 : vector<1x128xf32> to vector<16x128xf32>
    %14 = arith.addf %11, %13 : vector<16x128xf32>
    %cst_11 = arith.constant 0.000000e+00 : f32
    %15 = vector.broadcast %cst_11 : f32 to vector<16x128xf32>
    %16 = arith.maximumf %14, %15 : vector<16x128xf32>
    %17 = arith.truncf %16 : vector<16x128xf32> to vector<16x128xbf16>
    %c0_12 = arith.constant 0 : index
    %c0_13 = arith.constant 0 : index
    %18 = vector.load %arg6[%c0_12, %c0_13] : memref<128x128xbf16, #tpu.memory_space<vmem>>, vector<128x128xbf16>
    %cst_14 = arith.constant dense<0.000000e+00> : vector<16x128xf32>
    %19 = tpu.matmul %17, %18, %cst_14 {dimension_numbers = #tpu.dot_dimension_numbers<[1], [0], [0], [1], [0, 0, 1, 1], [], []>} : vector<16x128xbf16>, vector<128x128xbf16>, vector<16x128xf32> -> vector<16x128xf32>
    %c0_15 = arith.constant 0 : index
    %c0_16 = arith.constant 0 : index
    %20 = vector.load %arg7[%c0_15, %c0_16] : memref<1x128xf32, #tpu.memory_space<vmem>>, vector<1x128xf32>
    %21 = vector.broadcast %20 : vector<1x128xf32> to vector<16x128xf32>
    %22 = arith.addf %19, %21 : vector<16x128xf32>
    %cst_17 = arith.constant 0.000000e+00 : f32
    %23 = vector.broadcast %cst_17 : f32 to vector<16x128xf32>
    %24 = arith.maximumf %22, %23 : vector<16x128xf32>
    %25 = arith.truncf %24 : vector<16x128xf32> to vector<16x128xbf16>
    %c0_18 = arith.constant 0 : index
    %c0_19 = arith.constant 0 : index
    %26 = vector.load %arg8[%c0_18, %c0_19] : memref<128x784xbf16, #tpu.memory_space<vmem>>, vector<128x784xbf16>
    %cst_20 = arith.constant dense<0.000000e+00> : vector<16x784xf32>
    %27 = tpu.matmul %25, %26, %cst_20 {dimension_numbers = #tpu.dot_dimension_numbers<[1], [0], [0], [1], [0, 0, 1, 1], [], []>} : vector<16x128xbf16>, vector<128x784xbf16>, vector<16x784xf32> -> vector<16x784xf32>
    %c0_21 = arith.constant 0 : index
    %c0_22 = arith.constant 0 : index
    %28 = vector.load %arg9[%c0_21, %c0_22] : memref<1x784xf32, #tpu.memory_space<vmem>>, vector<1x784xf32>
    %29 = vector.broadcast %28 : vector<1x784xf32> to vector<16x784xf32>
    %30 = arith.addf %27, %29 : vector<16x784xf32>
    %31 = arith.truncf %30 : vector<16x784xf32> to vector<16x784xbf16>
    %32 = arith.negf %31 : vector<16x784xbf16>
    %33 = math.exp %32 : vector<16x784xbf16>
    %cst_23 = arith.constant 1.000000e+00 : bf16
    %34 = vector.broadcast %cst_23 : bf16 to vector<16x784xbf16>
    %35 = arith.addf %34, %33 : vector<16x784xbf16>
    %36 = arith.divf %34, %35 : vector<16x784xbf16>
    %c0_24 = arith.constant 0 : index
    %c0_25 = arith.constant 0 : index
    %37 = vector.load %arg10[%c0_24, %c0_25] : memref<16x784xbf16, #tpu.memory_space<vmem>>, vector<16x784xbf16>
    tpu.vector_store %arg10[%c0_24, %c0_25], %36 {strides = array<i32>} : memref<16x784xbf16, #tpu.memory_space<vmem>>, vector<16x784xbf16>,
    return
  }
  func.func @transform_0(%arg0: i32) -> (i32, i32) {
    %c0_i32 = arith.constant 0 : i32
    %c0_i32_0 = arith.constant 0 : i32
    return %arg0, %c0_i32 : i32, i32
  }
  func.func @transform_1(%arg0: i32) -> (i32, i32) {
    %c0_i32 = arith.constant 0 : i32
    %c0_i32_0 = arith.constant 0 : i32
    %c0_i32_1 = arith.constant 0 : i32
    return %c0_i32, %c0_i32_0 : i32, i32
  }
  func.func @transform_2(%arg0: i32) -> (i32, i32) {
    %c0_i32 = arith.constant 0 : i32
    %c0_i32_0 = arith.constant 0 : i32
    %c0_i32_1 = arith.constant 0 : i32
    return %c0_i32, %c0_i32_0 : i32, i32
  }
  func.func @transform_3(%arg0: i32) -> (i32, i32) {
    %c0_i32 = arith.constant 0 : i32
    %c0_i32_0 = arith.constant 0 : i32
    %c0_i32_1 = arith.constant 0 : i32
    return %c0_i32, %c0_i32_0 : i32, i32
  }
  func.func @transform_4(%arg0: i32) -> (i32, i32) {
    %c0_i32 = arith.constant 0 : i32
    %c0_i32_0 = arith.constant 0 : i32
    %c0_i32_1 = arith.constant 0 : i32
    return %c0_i32, %c0_i32_0 : i32, i32
  }
  func.func @transform_5(%arg0: i32) -> (i32, i32) {
    %c0_i32 = arith.constant 0 : i32
    %c0_i32_0 = arith.constant 0 : i32
    %c0_i32_1 = arith.constant 0 : i32
    return %c0_i32, %c0_i32_0 : i32, i32
  }
  func.func @transform_6(%arg0: i32) -> (i32, i32) {
    %c0_i32 = arith.constant 0 : i32
    %c0_i32_0 = arith.constant 0 : i32
    %c0_i32_1 = arith.constant 0 : i32
    return %c0_i32, %c0_i32_0 : i32, i32
  }
  func.func @transform_7(%arg0: i32) -> (i32, i32) {
    %c0_i32 = arith.constant 0 : i32
    %c0_i32_0 = arith.constant 0 : i32
    %c0_i32_1 = arith.constant 0 : i32
    return %c0_i32, %c0_i32_0 : i32, i32
  }
  func.func @transform_8(%arg0: i32) -> (i32, i32) {
    %c0_i32 = arith.constant 0 : i32
    %c0_i32_0 = arith.constant 0 : i32
    %c0_i32_1 = arith.constant 0 : i32
    return %c0_i32, %c0_i32_0 : i32, i32
  }
  func.func @transform_9(%arg0: i32) -> (i32, i32) {
    %c0_i32 = arith.constant 0 : i32
    %c0_i32_0 = arith.constant 0 : i32
    return %arg0, %c0_i32 : i32, i32
  }
}

</mosaic_0001>

<bundles_post_ra>
// kernel: mnist_autoencoder_forward.1
= control target key start
LH: loop header
LB: loop body
LE: loop exit
PB: predicated region body
PF: predicated region fallthrough
CT: control target
= control target key end

     0   :  { %vm451_vm0 = vcmask 130048   ;;  %vm1355_vm1 = vcmask 125952   ;;  %s2726_s1 = inlined_call_operand.vmem [shape: bf16[784,128], index: 1, kind: input, shape index: {}]   ;;  %s2727_s2 = inlined_call_operand.vmem [shape: f32[1,128], index: 2, kind: input, shape index: {}]   ;;  %s2728_s0 = inlined_call_operand.vmem [shape: f32[16,784], index: 0, kind: input, shape index: {}]   ;;  %s2729_s4 = inlined_call_operand.vmem [shape: f32[1,128], index: 4, kind: input, shape index: {}]   ;;  %s2730_s3 = inlined_call_operand.vmem [shape: bf16[128,128], index: 3, kind: input, shape index: {}]   ;;  %s2731_s5 = inlined_call_operand.vmem [shape: bf16[128,128], index: 5, kind: input, shape index: {}]   ;;  %s2732_s6 = inlined_call_operand.vmem [shape: f32[1,128], index: 6, kind: input, shape index: {}]   ;;  %s2733_s7 = inlined_call_operand.vmem [shape: bf16[128,784], index: 7, kind: input, shape index: {}]   ;;  %s2734_s8 = inlined_call_operand.vmem [shape: f32[1,784], index: 8, kind: input, shape index: {}]   ;;  %s2735_s9 = inlined_call_operand.vmem [shape: bf16[16,784], index: 9, kind: output, shape index: {}]  }
   0x1   :  { %v1857_v0 = vld [vmem:[%s2726_s1 + $0x38] sm:$0xff]  ;;  %v1856_v4 = vld [vmem:[%s2726_s1 + $0x30] sm:$0xff]  ;;  %v1855_v8 = vld [vmem:[%s2726_s1 + $0x28] sm:$0xff] }
   0x2   :  { %v1865_v1 = vld [vmem:[%s2726_s1 + $0x78] sm:$0xff]  ;;  %455 = vmatpush.bf16.msra.mxu0 %v1857_v0  ;;  %v1864_v5 = vld [vmem:[%s2726_s1 + $0x70] sm:$0xff]  ;;  %v1863_v9 = vld [vmem:[%s2726_s1 + $0x68] sm:$0xff] }
   0x3   :  { %v1873_v2 = vld [vmem:[%s2726_s1 + $0xb8] sm:$0xff]  ;;  %469 = vmatpush.bf16.msra.mxu1 %v1865_v1  ;;  %v1872_v6 = vld [vmem:[%s2726_s1 + $0xb0] sm:$0xff]  ;;  %v1871_v10 = vld [vmem:[%s2726_s1 + $0xa8] sm:$0xff] }
   0x4   :  { %v1881_v3 = vld [vmem:[%s2726_s1 + $0xf8] sm:$0xff]  ;;  %483 = vmatpush.bf16.msra.mxu2 %v1873_v2  ;;  %v1880_v7 = vld [vmem:[%s2726_s1 + $0xf0] sm:$0xff]  ;;  %v1879_v11 = vld [vmem:[%s2726_s1 + $0xe8] sm:$0xff] }
   0x5   :  { %497 = vmatpush.bf16.msra.mxu3 %v1881_v3  ;;  %v1854_v12 = vld [vmem:[%s2726_s1 + $0x20] sm:$0xff]  ;;  %v1853_v16 = vld [vmem:[%s2726_s1 + $0x18] sm:$0xff]  ;;  %v1852_v20 = vld [vmem:[%s2726_s1 + $0x10] sm:$0xff] }
   0x6   :  { %456 = vmatpush.bf16.msra.mxu0 %v1856_v4  ;;  %v1862_v13 = vld [vmem:[%s2726_s1 + $0x60] sm:$0xff]  ;;  %v1861_v17 = vld [vmem:[%s2726_s1 + $0x58] sm:$0xff]  ;;  %v1860_v21 = vld [vmem:[%s2726_s1 + $0x50] sm:$0xff] }
   0x7   :  { %470 = vmatpush.bf16.msra.mxu1 %v1864_v5  ;;  %v1870_v14 = vld [vmem:[%s2726_s1 + $0xa0] sm:$0xff]  ;;  %v1869_v18 = vld [vmem:[%s2726_s1 + $0x98] sm:$0xff]  ;;  %v1868_v22 = vld [vmem:[%s2726_s1 + $0x90] sm:$0xff] }
   0x8   :  { %484 = vmatpush.bf16.msra.mxu2 %v1872_v6  ;;  %v1878_v15 = vld [vmem:[%s2726_s1 + $0xe0] sm:$0xff]  ;;  %v1877_v19 = vld [vmem:[%s2726_s1 + $0xd8] sm:$0xff]  ;;  %v1876_v23 = vld [vmem:[%s2726_s1 + $0xd0] sm:$0xff] }
   0x9   :  { %498 = vmatpush.bf16.msra.mxu3 %v1880_v7  ;;  %v1851_v24 = vld [vmem:[%s2726_s1 + $0x8] sm:$0xff]  ;;  %v1850_v28 = vld [vmem:[%s2726_s1] sm:$0xff]  ;;  %v41_v31 = vld [vmem:[%s2728_s0 + $0x38] sm:$0xff] }
   0xa   :  { %457 = vmatpush.bf16.msra.mxu0 %v1855_v8  ;;  %v1859_v25 = vld [vmem:[%s2726_s1 + $0x48] sm:$0xff]  ;;  %v1858_v29 = vld [vmem:[%s2726_s1 + $0x40] sm:$0xff]  ;;  %v1889_v34 = vld [vmem:[%s2726_s1 + $0x138] sm:$0xff] }
   0xb   :  { %471 = vmatpush.bf16.msra.mxu1 %v1863_v9  ;;  %v1867_v26 = vld [vmem:[%s2726_s1 + $0x88] sm:$0xff]  ;;  %v34_v30 = vld [vmem:[%s2728_s0] sm:$0xff]  ;;  %v1897_v35 = vld [vmem:[%s2726_s1 + $0x178] sm:$0xff] }
   0xc   :  { %485 = vmatpush.bf16.msra.mxu2 %v1871_v10  ;;  %v1875_v27 = vld [vmem:[%s2726_s1 + $0xc8] sm:$0xff]  ;;  %v42_v33 = vld [vmem:[%s2728_s0 + $0x40] sm:$0xff]  ;;  %v36_v38 = vld [vmem:[%s2728_s0 + $0x10] sm:$0xff]  ;;  %v48_v40 = vpack.c.bf16 %v41_v31, %v34_v30 }
   0xd   :  { %499 = vmatpush.bf16.msra.mxu3 %v1879_v11  ;;  %v35_v32 = vld [vmem:[%s2728_s0 + $0x8] sm:$0xff]  ;;  %v1866_v36 = vld [vmem:[%s2726_s1 + $0x80] sm:$0xff]  ;;  %v37_v41 = vld [vmem:[%s2728_s0 + $0x18] sm:$0xff] }
   0xe   :  { %458 = vmatpush.bf16.msra.mxu0 %v1854_v12  ;;  %v1874_v37 = vld [vmem:[%s2726_s1 + $0xc0] sm:$0xff]  ;;  %v43_v39 = vld [vmem:[%s2728_s0 + $0x48] sm:$0xff]  ;;  %v44_v42 = vld [vmem:[%s2728_s0 + $0x50] sm:$0xff]  ;;  %v49_v43 = vpack.c.bf16 %v42_v33, %v35_v32 }
   0xf   :  { %472 = vmatpush.bf16.msra.mxu1 %v1862_v13  ;;  %v1898_v44 = vld [vmem:[%s2726_s1 + $0x180] sm:$0xff]  ;;  %v1888_v45 = vld [vmem:[%s2726_s1 + $0x130] sm:$0xff]  ;;  %v50_v47 = vpack.c.bf16 %v43_v39, %v36_v38  ;;  %v51_v48 = vpack.c.bf16 %v44_v42, %v37_v41  ;;  %v1887_v49 = vld [vmem:[%s2726_s1 + $0x128] sm:$0xff] }
  0x10   :  { %486 = vmatpush.bf16.msra.mxu2 %v1870_v14  ;;  %v1896_v46 = vld [vmem:[%s2726_s1 + $0x170] sm:$0xff]  ;;  %v1895_v50 = vld [vmem:[%s2726_s1 + $0x168] sm:$0xff]  ;;  %v1886_v51 = vld [vmem:[%s2726_s1 + $0x120] sm:$0xff] }
  0x11   :  { %500 = vmatpush.bf16.msra.mxu3 %v1878_v15  ;;  %v1894_v52 = vld [vmem:[%s2726_s1 + $0x160] sm:$0xff]  ;;  %v1885_v53 = vld [vmem:[%s2726_s1 + $0x118] sm:$0xff]  ;;  %v40_v55 = vld [vmem:[%s2728_s0 + $0x30] sm:$0xff] }
  0x12   :  { %459 = vmatpush.bf16.msra.mxu0 %v1853_v16  ;;  %v1893_v54 = vld [vmem:[%s2726_s1 + $0x158] sm:$0xff]  ;;  %v47_v56 = vld [vmem:[%s2728_s0 + $0x68] sm:$0xff]  ;;  %v1884_v57 = vld [vmem:[%s2726_s1 + $0x110] sm:$0xff] }
  0x13   :  { %473 = vmatpush.bf16.msra.mxu1 %v1861_v17  ;;  %v1892_v58 = vld [vmem:[%s2726_s1 + $0x150] sm:$0xff]  ;;  %v54_v59 = vpack.c.bf16 %v47_v56, %v40_v55  ;;  %v1883_v60 = vld [vmem:[%s2726_s1 + $0x108] sm:$0xff]  ;;  %v1882_v62 = vld [vmem:[%s2726_s1 + $0x100] sm:$0xff] }
  0x14   :  { %487 = vmatpush.bf16.msra.mxu2 %v1869_v18  ;;  %v1891_v61 = vld [vmem:[%s2726_s1 + $0x148] sm:$0xff]  ;;  %v1890_v63 = vld [vmem:[%s2726_s1 + $0x140] sm:$0xff]  ;;  %v45_v1 = vld [vmem:[%s2728_s0 + $0x58] sm:$0xff] }
  0x15   :  { %501 = vmatpush.bf16.msra.mxu3 %v1877_v19  ;;  %v38_v0 = vld [vmem:[%s2728_s0 + $0x20] sm:$0xff]  ;;  %v39_v2 = vld [vmem:[%s2728_s0 + $0x28] sm:$0xff]  ;;  %v1906_v6 = vld [vmem:[%s2730_s3 + $0x38] sm:$0xff] }
  0x16   :  { %460 = vmatpush.bf16.msra.mxu0 %v1852_v20  ;;  %v46_v3 = vld [vmem:[%s2728_s0 + $0x60] sm:$0xff]  ;;  %v52_v4 = vpack.c.bf16 %v45_v1, %v38_v0  ;;  %v1905_v7 = vld [vmem:[%s2730_s3 + $0x30] sm:$0xff]  ;;  %v1904_v8 = vld [vmem:[%s2730_s3 + $0x28] sm:$0xff] }
  0x17   :  { %474 = vmatpush.bf16.msra.mxu1 %v1860_v21  ;;  %v53_v5 = vpack.c.bf16 %v46_v3, %v39_v2  ;;  %v1903_v9 = vld [vmem:[%s2730_s3 + $0x20] sm:$0xff]  ;;  %v1902_v10 = vld [vmem:[%s2730_s3 + $0x18] sm:$0xff]  ;;  %v1901_v11 = vld [vmem:[%s2730_s3 + $0x10] sm:$0xff] }
  0x18   :  { %488 = vmatpush.bf16.msra.mxu2 %v1868_v22  ;;  %v1900_v12 = vld [vmem:[%s2730_s3 + $0x8] sm:$0xff]  ;;  %v1899_v16 = vld [vmem:[%s2730_s3] sm:$0xff]  ;;  %v1914_v18 = vld [vmem:[%s2731_s5 + $0x38] sm:$0xff] }
  0x19   :  { %502 = vmatpush.bf16.msra.mxu3 %v1876_v23  ;;  %v1972_v17 = vld [vmem:[%s2727_s2] ss:$0 sm:$0xff]  ;;  %v1913_v20 = vld [vmem:[%s2731_s5 + $0x30] sm:$0xff]  ;;  %v1967_v55 = vld [vmem:[%s2733_s7 + $0x1a0] sm:$0xf0] }
  0x1a   :  { %461 = vmatpush.bf16.msra.mxu0 %v1851_v24  ;;  %v1964_v56 = vld [vmem:[%s2733_s7 + $0x18c] sm:$0xf]  ;;  %v1957_v1 = vld [vmem:[%s2733_s7 + $0x154] sm:$0xf]  ;;  %v1798_v3 = vld [vmem:[%s2733_s7 + $0x16c] sm:$0xf0] }
  0x1b   :  { %475 = vmatpush.bf16.msra.mxu1 %v1859_v25  ;;  %v1912_v25 = vld [vmem:[%s2731_s5 + $0x28] sm:$0xff] }
  0x1c   :  { %489 = vmatpush.bf16.msra.mxu2 %v1867_v26  ;;  %v1960_v0 = vld [vmem:[%s2733_s7 + $0x168] sm:$0xf0] }
  0x1d   :  { %503 = vmatpush.bf16.msra.mxu3 %v1875_v27 }
  0x1e   :  { %462 = vmatpush.bf16.msra.mxu0 %v1850_v28 }
  0x1f   :  { %476 = vmatpush.bf16.msra.mxu1 %v1858_v29  ;;  %v1911_v29 = vld [vmem:[%s2731_s5 + $0x20] sm:$0xff] }
  0x20   :  { %490 = vmatpush.bf16.msra.mxu2 %v1866_v36 }
  0x21   :  { %504 = vmatpush.bf16.msra.mxu3 %v1874_v37  ;;  %463 = vmatmul.bf16.vlgmr.msra.gmra.mxu0 %v48_v40 }
  0x22   :  { %511 = vmatpush.bf16.msrb.mxu0 %v1889_v34  ;;  %477 = vmatmul.bf16.vlgmr.msra.gmra.mxu1 %v49_v43 }
  0x23   :  { %525 = vmatpush.bf16.msrb.mxu1 %v1897_v35  ;;  %491 = vmatmul.bf16.vlgmr.msra.gmra.mxu2 %v50_v47 }
  0x24   :  { %546 = vmatpush.bf16.msrb.mxu2 %v1898_v44  ;;  %505 = vmatmul.bf16.vlgmr.msra.gmra.mxu3 %v51_v48 }
  0x25   :  { %624 = vmatpush.bf16.msrb.mxu3 %v1906_v6  ;;  %v1801_v6 = vor.u32 %v1957_v1, %v1798_v3 }
  0x26   :  { %512 = vmatpush.bf16.msrb.mxu0 %v1888_v45 }
  0x27   :  { %526 = vmatpush.bf16.msrb.mxu1 %v1896_v46 }
  0x28   :  { %709 = vmatpush.bf16.msra.mxu2 %v1914_v18 }
  0x29   :  { %625 = vmatpush.bf16.msrb.mxu3 %v1905_v7 }
  0x2a   :  { %513 = vmatpush.bf16.msrb.mxu0 %v1887_v49 }
  0x2b   :  { %527 = vmatpush.bf16.msrb.mxu1 %v1895_v50  ;;  %v1910_v50 = vld [vmem:[%s2731_s5 + $0x18] sm:$0xff] }
  0x2c   :  { %710 = vmatpush.bf16.msra.mxu2 %v1913_v20  ;;  %v1965_v20 = vld [vmem:[%s2733_s7 + $0x194] sm:$0xf] }
  0x2d   :  { %626 = vmatpush.bf16.msrb.mxu3 %v1904_v8  ;;  %v1768_v8 = vld [vmem:[%s2733_s7 + $0x118] sm:$0xf] }
  0x2e   :  { %514 = vmatpush.bf16.msrb.mxu0 %v1886_v51  ;;  %v1909_v51 = vld [vmem:[%s2731_s5 + $0x10] sm:$0xff] }
  0x2f   :  { %528 = vmatpush.bf16.msrb.mxu1 %v1894_v52  ;;  %v1908_v52 = vld [vmem:[%s2731_s5 + $0x8] sm:$0xff] }
  0x30   :  { %711 = vmatpush.bf16.msra.mxu2 %v1912_v25 }
  0x31   :  { %627 = vmatpush.bf16.msrb.mxu3 %v1903_v9  ;;  %v1953_v9 = vld [vmem:[%s2733_s7 + $0x130] sm:$0xf0] }
  0x32   :  { %515 = vmatpush.bf16.msrb.mxu0 %v1885_v53  ;;  %v1907_v53 = vld [vmem:[%s2731_s5] sm:$0xff] }
  0x33   :  { %529 = vmatpush.bf16.msrb.mxu1 %v1893_v54  ;;  %1561 = vmatmul.msk.bf16.vlgmr.msrb.gmra.mxu2 %vm451_vm0, %v54_v59  ;;  %v1824_v54 = vld [vmem:[%s2733_s7 + $0x188] sm:$0xf]  ;;  %v1832_v59 = vld [vmem:[%s2733_s7 + $0x190] sm:$0xf] }
  0x34   :  { %712 = vmatpush.bf16.msra.mxu2 %v1911_v29  ;;  %v1939_v29 = vld [vmem:[%s2733_s7 + $0xc0] sm:$0xf0] }
  0x35   :  { %628 = vmatpush.bf16.msrb.mxu3 %v1902_v10  ;;  %v1950_v10 = vld [vmem:[%s2733_s7 + $0x11c] sm:$0xf] }
  0x36   :  { %516 = vmatpush.bf16.msrb.mxu0 %v1884_v57  ;;  %v1825_v57 = vor.u32 %v1967_v55, %v1824_v54 }
  0x37   :  { %530 = vmatpush.bf16.msrb.mxu1 %v1892_v58  ;;  %v1826_v58 = vld [vmem:[%s2733_s7 + $0x1a4] sm:$0xf0] }
  0x38   :  { %713 = vmatpush.bf16.msra.mxu2 %v1910_v50  ;;  %v1686_v50 = vld [vmem:[%s2733_s7 + $0x8c] sm:$0xf0] }
  0x39   :  { %629 = vmatpush.bf16.msrb.mxu3 %v1901_v11  ;;  %v1770_v11 = vld [vmem:[%s2733_s7 + $0x134] sm:$0xf0] }
  0x3a   :  { %517 = vmatpush.bf16.msrb.mxu0 %v1883_v60  ;;  %v1968_v60 = vld [vmem:[%s2733_s7 + $0x1a8] sm:$0xf0] }
  0x3b   :  { %531 = vmatpush.bf16.msrb.mxu1 %v1891_v61  ;;  %v1829_v61 = vor.u32 %v1964_v56, %v1826_v58  ;;  %v1656_v58 = vld [vmem:[%s2733_s7 + $0x38] sm:$0xf] }
  0x3c   :  { %714 = vmatpush.bf16.msra.mxu2 %v1909_v51  ;;  %v1692_v51 = vld [vmem:[%s2733_s7 + $0x78] sm:$0xf] }
  0x3d   :  { %630 = vmatpush.bf16.msrb.mxu3 %v1900_v12  ;;  %v1776_v12 = vld [vmem:[%s2733_s7 + $0x120] sm:$0xf] }
  0x3e   :  { %518 = vmatpush.bf16.msrb.mxu0 %v1882_v62  ;;  %v1833_v62 = vor.u32 %v1968_v60, %v1832_v59  ;;  %v1925_v59 = vld [vmem:[%s2733_s7 + $0x50] sm:$0xf0]  ;;  %v1922_v60 = vld [vmem:[%s2733_s7 + $0x3c] sm:$0xf] }
  0x3f   :  { %532 = vmatpush.bf16.msrb.mxu1 %v1890_v63  ;;  %v1796_v63 = vld [vmem:[%s2733_s7 + $0x150] sm:$0xf] }
  0x40   :  { %715 = vmatpush.bf16.msra.mxu2 %v1908_v52  ;;  %v1797_v2 = vor.u32 %v1960_v0, %v1796_v63  ;;  %v1933_v52 = vld [vmem:[%s2733_s7 + $0x90] sm:$0xf0]  ;;  %v1926_v63 = vld [vmem:[%s2733_s7 + $0x58] sm:$0xf0]  ;;  %v1657_v0 = vor.u32 %v1925_v59, %v1656_v58  ;;  %v1948_v58 = vld [vmem:[%s2733_s7 + $0x108] sm:$0xf0] }
  0x41   :  { %519 = vmatmul.bf16.vlgmr.msrb.gmra.mxu0 %v52_v4  ;;  %631 = vmatpush.bf16.msrb.mxu3 %v1899_v16  ;;  %v1804_v4 = vld [vmem:[%s2733_s7 + $0x158] sm:$0xf]  ;;  %v1946_v16 = vld [vmem:[%s2733_s7 + $0xf8] sm:$0xf0]  ;;  %v1945_v59 = vld [vmem:[%s2733_s7 + $0xf4] sm:$0xf] }
  0x42   :  { %533 = vmatmul.bf16.vlgmr.msrb.gmra.mxu1 %v53_v5  ;;  %1094 = vmatpush.bf16.msra.mxu0 %v1825_v57  ;;  %v1961_v5 = vld [vmem:[%s2733_s7 + $0x170] sm:$0xf0]  ;;  %v1693_v57 = vor.u32 %v1933_v52, %v1692_v51  ;;  %v1792_v51 = vld [vmem:[%s2733_s7 + $0x130] sm:$0xf]  ;;  %v1956_v52 = vld [vmem:[%s2733_s7 + $0x148] sm:$0xf0] }
  0x43   :  { %1108 = vmatpush.bf16.msra.mxu1 %v1829_v61  ;;  %v1805_v7 = vor.u32 %v1961_v5, %v1804_v4  ;;  %v1658_v61 = vld [vmem:[%s2733_s7 + $0x54] sm:$0xf0]  ;;  %v1628_v4 = vld [vmem:[%s2733_s7] sm:$0xf]  ;;  %v1918_v5 = vld [vmem:[%s2733_s7 + $0x18] sm:$0xf0] }
  0x44   :  { %716 = vmatpush.bf16.msra.mxu2 %v1907_v53  ;;  %v1973_v53 = vld [vmem:[%s2729_s4] ss:$0 sm:$0xff] }
  0x45   :  { %1122 = vmatpush.bf16.msra.mxu3 %v1833_v62  ;;  %v1664_v62 = vld [vmem:[%s2733_s7 + $0x40] sm:$0xf] }
  0x46   :  { %1095 = vmatpush.bf16.msra.mxu0 %v1797_v2  ;;  %v1661_v2 = vor.u32 %v1922_v60, %v1658_v61  ;;  %v1665_v3 = vor.u32 %v1926_v63, %v1664_v62  ;;  %v1758_v60 = vld [vmem:[%s2733_s7 + $0x10c] sm:$0xf0]  ;;  %v1764_v63 = vld [vmem:[%s2733_s7 + $0xf8] sm:$0xf] }
  0x47   :  { %1109 = vmatpush.bf16.msra.mxu1 %v1801_v6  ;;  %v1761_v62 = vor.u32 %v1945_v59, %v1758_v60 }
  0x49   :  { %1123 = vmatpush.bf16.msra.mxu3 %v1805_v7  ;;  %v1915_v7 = vld [vmem:[%s2733_s7 + $0x4] sm:$0xf] }
  0x9e   :  { %v464_v13 = vpop.f32.mrf.mxu0 }
  0x9f   :  { %v478_v14 = vpop.f32.mrf.mxu1  ;;  %v465_v19 = vadd.f32 %v1972_v17, %v464_v13  ;;  %v1954_v13 = vld [vmem:[%s2733_s7 + $0x138] sm:$0xf0] }
  0xa0   :  { %v1777_v18 = vor.u32 %v1954_v13, %v1776_v12  ;;  %v1629_v12 = vor.u32 %v1918_v5, %v1628_v4  ;;  %v1938_v4 = vld [vmem:[%s2733_s7 + $0xbc] sm:$0xf] }
  0xa1   :  { %v479_v24 = vadd.f32 %v478_v14, %v465_v19  ;;  %v1769_v14 = vor.u32 %v1953_v9, %v1768_v8  ;;  %v1943_v19 = vld [vmem:[%s2733_s7 + $0xe4] sm:$0xf]  ;;  %v1630_v8 = vld [vmem:[%s2733_s7 + $0x1c] sm:$0xf0] }
  0xa2   :  { %1124 = vmatpush.bf16.msra.mxu3 %v1777_v18  ;;  %v1937_v18 = vld [vmem:[%s2733_s7 + $0xb4] sm:$0xf] }
  0xa3   :  { %1096 = vmatpush.bf16.msra.mxu0 %v1769_v14 }
  0xa6   :  { %v492_v15 = vpop.f32.mrf.mxu2  ;;  %v466_v21 = vpop.f32.mrf.mxu0 }
  0xa7   :  { %v480_v22 = vpop.f32.mrf.mxu1  ;;  %v506_v26 = vpop.f32.mrf.mxu3  ;;  %v467_v27 = vadd.f32 %v1972_v17, %v466_v21  ;;  %v493_v28 = vadd.f32 %v492_v15, %v479_v24  ;;  %v1740_v15 = vld [vmem:[%s2733_s7 + $0xe0] sm:$0xf]  ;;  %v1773_v17 = vor.u32 %v1950_v10, %v1770_v11  ;;  %v1834_v21 = vld [vmem:[%s2733_s7 + $0x1ac] sm:$0xf0]  ;;  %v1947_v24 = vld [vmem:[%s2733_s7 + $0x100] sm:$0xf0] }
  0xa8   :  { %v1837_v25 = vor.u32 %v1965_v20, %v1834_v21  ;;  %v1636_v10 = vld [vmem:[%s2733_s7 + $0x8] sm:$0xf]  ;;  %v1919_v11 = vld [vmem:[%s2733_s7 + $0x20] sm:$0xf0]  ;;  %v1840_v20 = vld [vmem:[%s2733_s7 + $0x198] sm:$0xf] }
  0xa9   :  { %v481_v30 = vadd.f32 %v480_v22, %v467_v27  ;;  %v507_v33 = vadd.f32 %v506_v26, %v493_v28  ;;  %v1742_v22 = vld [vmem:[%s2733_s7 + $0xfc] sm:$0xf0]  ;;  %v1958_v26 = vld [vmem:[%s2733_s7 + $0x15c] sm:$0xf]  ;;  %v1741_v27 = vor.u32 %v1946_v16, %v1740_v15  ;;  %v1712_v28 = vld [vmem:[%s2733_s7 + $0xa8] sm:$0xf]  ;;  %1110 = vmatpush.bf16.msra.mxu1 %v1773_v17  ;;  %v1633_v15 = vor.u32 %v1915_v7, %v1630_v8 }
  0xaa   :  { %1136 = vmatpush.bf16.msrb.mxu2 %v1837_v25  ;;  %v1637_v16 = vor.u32 %v1919_v11, %v1636_v10  ;;  %v1736_v7 = vld [vmem:[%s2733_s7 + $0xc0] sm:$0xf]  ;;  %v1942_v8 = vld [vmem:[%s2733_s7 + $0xd8] sm:$0xf0] }
  0xab   :  { %1097 = vmatpush.bf16.msra.mxu0 %v1741_v27  ;;  %v1848_v27 = vld [vmem:[%s2733_s7 + $0x1a0] sm:$0xf]  ;;  %v1737_v10 = vor.u32 %v1942_v8, %v1736_v7 }
  0xac   :  { %v1700_v11 = vld [vmem:[%s2733_s7 + $0x80] sm:$0xf] }
  0xae   :  { %v494_v23 = vpop.f32.mrf.mxu2 }
  0xaf   :  { %v495_v35 = vadd.f32 %v494_v23, %v481_v30  ;;  %v508_v37 = vpop.f32.mrf.mxu3  ;;  %v1748_v23 = vld [vmem:[%s2733_s7 + $0xe8] sm:$0xf]  ;;  %v1806_v30 = vld [vmem:[%s2733_s7 + $0x174] sm:$0xf0] }
  0xb1   :  { %v509_v38 = vadd.f32 %v508_v37, %v495_v35  ;;  %v1720_v35 = vld [vmem:[%s2733_s7 + $0xb0] sm:$0xf]  ;;  %v1940_v37 = vld [vmem:[%s2733_s7 + $0xc8] sm:$0xf0] }
  0xb6   :  { %v548_v34 = vpop.f32.mrf.mxu2 }
  0xbe   :  { %v520_v31 = vpop.f32.mrf.mxu0  ;;  %v550_v45 = vpop.f32.mrf.mxu2 }
  0xbf   :  { %v534_v32 = vpop.f32.mrf.mxu1  ;;  %v521_v36 = vadd.f32 %v520_v31, %v507_v33  ;;  %v1745_v31 = vor.u32 %v1943_v19, %v1742_v22  ;;  %v1936_v33 = vld [vmem:[%s2733_s7 + $0xac] sm:$0xf]  ;;  %v1722_v19 = vld [vmem:[%s2733_s7 + $0xcc] sm:$0xf0]  ;;  %v1969_v22 = vld [vmem:[%s2733_s7 + $0x1b0] sm:$0xf0] }
  0xc0   :  { %v1725_v21 = vor.u32 %v1937_v18, %v1722_v19  ;;  %v1841_v25 = vor.u32 %v1969_v22, %v1840_v20  ;;  %v1672_v20 = vld [vmem:[%s2733_s7 + $0x48] sm:$0xf]  ;;  %v1924_v22 = vld [vmem:[%s2733_s7 + $0x4c] sm:$0xf] }
  0xc1   :  { %v535_v39 = vadd.f32 %v534_v32, %v521_v36  ;;  %v1749_v32 = vor.u32 %v1947_v24, %v1748_v23  ;;  %v1809_v36 = vor.u32 %v1958_v26, %v1806_v30  ;;  %1111 = vmatpush.bf16.msra.mxu1 %v1745_v31  ;;  %v1966_v23 = vld [vmem:[%s2733_s7 + $0x19c] sm:$0xf]  ;;  %v1842_v24 = vld [vmem:[%s2733_s7 + $0x1b4] sm:$0xf0] }
  0xc2   :  { %v1845_v26 = vor.u32 %v1966_v23, %v1842_v24  ;;  %v1930_v30 = vld [vmem:[%s2733_s7 + $0x7c] sm:$0xf]  ;;  %v1694_v31 = vld [vmem:[%s2733_s7 + $0x94] sm:$0xf0]  ;;  %v1674_v23 = vld [vmem:[%s2733_s7 + $0x64] sm:$0xf0] }
  0xc3   :  { %v549_v43 = vadd.f32 %v548_v34, %v535_v39  ;;  %v1714_v34 = vld [vmem:[%s2733_s7 + $0xc4] sm:$0xf0]  ;;  %v1778_v39 = vld [vmem:[%s2733_s7 + $0x13c] sm:$0xf0]  ;;  %1137 = vmatpush.bf16.msrb.mxu2 %v1809_v36  ;;  %1125 = vmatpush.bf16.msra.mxu3 %v1749_v32  ;;  %v1680_v24 = vld [vmem:[%s2733_s7 + $0x50] sm:$0xf] }
  0xc4   :  { %v1812_v32 = vld [vmem:[%s2733_s7 + $0x160] sm:$0xf] }
  0xc5   :  { %v553_v47 = vmax.f32 %v549_v43, 0.0  ;;  %v1814_v36 = vld [vmem:[%s2733_s7 + $0x17c] sm:$0xf0] }
  0xc6   :  { %v522_v40 = vpop.f32.mrf.mxu0 }
  0xc7   :  { %v523_v41 = vadd.f32 %v522_v40, %v509_v38  ;;  %v536_v42 = vpop.f32.mrf.mxu1  ;;  %v1951_v38 = vld [vmem:[%s2733_s7 + $0x124] sm:$0xf]  ;;  %v1713_v40 = vor.u32 %v1939_v29, %v1712_v28  ;;  %v1970_v28 = vld [vmem:[%s2733_s7 + $0x1b8] sm:$0xf0] }
  0xc8   :  { %v1781_v43 = vor.u32 %v1951_v38, %v1778_v39  ;;  %v1849_v29 = vor.u32 %v1970_v28, %v1848_v27  ;;  %v1820_v39 = vld [vmem:[%s2733_s7 + $0x168] sm:$0xf]  ;;  %v1677_v27 = vor.u32 %v1924_v22, %v1674_v23 }
  0xc9   :  { %v537_v44 = vadd.f32 %v536_v42, %v523_v41  ;;  %v1684_v41 = vld [vmem:[%s2733_s7 + $0x70] sm:$0xf]  ;;  %v1932_v42 = vld [vmem:[%s2733_s7 + $0x88] sm:$0xf0]  ;;  %1098 = vmatpush.bf16.msra.mxu0 %v1713_v40  ;;  %v1963_v40 = vld [vmem:[%s2733_s7 + $0x180] sm:$0xf0] }
  0xca   :  { %v1685_v54 = vor.u32 %v1932_v42, %v1684_v41  ;;  %1138 = vmatpush.bf16.msrb.mxu2 %v1781_v43  ;;  %v1821_v41 = vor.u32 %v1963_v40, %v1820_v39  ;;  %v1923_v42 = vld [vmem:[%s2733_s7 + $0x44] sm:$0xf]  ;;  %v1666_v43 = vld [vmem:[%s2733_s7 + $0x5c] sm:$0xf0] }
  0xcb   :  { %v551_v46 = vadd.f32 %v550_v45, %v537_v44  ;;  %v1717_v44 = vor.u32 %v1936_v33, %v1714_v34  ;;  %v1721_v45 = vor.u32 %v1940_v37, %v1720_v35  ;;  %v1697_v33 = vor.u32 %v1930_v30, %v1694_v31  ;;  %v1962_v34 = vld [vmem:[%s2733_s7 + $0x178] sm:$0xf0]  ;;  %v1959_v35 = vld [vmem:[%s2733_s7 + $0x164] sm:$0xf]  ;;  %v1920_v30 = vld [vmem:[%s2733_s7 + $0x28] sm:$0xf0] }
  0xcc   :  { %v1813_v37 = vor.u32 %v1962_v34, %v1812_v32  ;;  %v1817_v38 = vor.u32 %v1959_v35, %v1814_v36  ;;  %v1917_v31 = vld [vmem:[%s2733_s7 + $0x14] sm:$0xf]  ;;  %v1646_v32 = vld [vmem:[%s2733_s7 + $0x2c] sm:$0xf0]  ;;  %v1974_v39 = vld [vmem:[%s2732_s6] ss:$0 sm:$0xff] }
  0xcd   :  { %v554_v48 = vmax.f32 %v551_v46, 0.0  ;;  %v1929_v46 = vld [vmem:[%s2733_s7 + $0x74] sm:$0xf]  ;;  %1112 = vmatpush.bf16.msra.mxu1 %v1717_v44  ;;  %1126 = vmatpush.bf16.msra.mxu3 %v1721_v45  ;;  %v1784_v44 = vld [vmem:[%s2733_s7 + $0x128] sm:$0xf]  ;;  %v1669_v45 = vor.u32 %v1923_v42, %v1666_v43  ;;  %v1649_v36 = vor.u32 %v1917_v31, %v1646_v32 }
  0xce   :  { %v1689_v56 = vor.u32 %v1929_v46, %v1686_v50  ;;  %1099 = vmatpush.bf16.msra.mxu0 %v1685_v54  ;;  %v1955_v46 = vld [vmem:[%s2733_s7 + $0x140] sm:$0xf0]  ;;  %v1916_v54 = vld [vmem:[%s2733_s7 + $0xc] sm:$0xf]  ;;  %v1921_v34 = vld [vmem:[%s2733_s7 + $0x30] sm:$0xf0] }
  0xcf   :  { %v555_v49 = vpack.c.bf16 %v554_v48, %v553_v47  ;;  %v1944_v47 = vld [vmem:[%s2733_s7 + $0xec] sm:$0xf]  ;;  %v1750_v48 = vld [vmem:[%s2733_s7 + $0x104] sm:$0xf0] }
  0xd0   :  { %v1753_v55 = vor.u32 %v1944_v47, %v1750_v48  ;;  %v1952_v47 = vld [vmem:[%s2733_s7 + $0x12c] sm:$0xf]  ;;  %v1786_v48 = vld [vmem:[%s2733_s7 + $0x144] sm:$0xf0] }
  0xd1   :  { %632 = vmatmul.bf16.vlgmr.msrb.gmra.mxu3 %v555_v49  ;;  %1113 = vmatpush.bf16.msra.mxu1 %v1689_v56  ;;  %v1789_v50 = vor.u32 %v1952_v47, %v1786_v48  ;;  %v1756_v56 = vld [vmem:[%s2733_s7 + $0xf0] sm:$0xf] }
  0xd2   :  { %1139 = vmatpush.bf16.msrb.mxu2 %v1753_v55  ;;  %1127 = vmatpush.bf16.msra.mxu3 %v1693_v57  ;;  %v1638_v55 = vld [vmem:[%s2733_s7 + $0x24] sm:$0xf0]  ;;  %v1757_v61 = vor.u32 %v1948_v58, %v1756_v56 }
  0xd3   :  { %1100 = vmatpush.bf16.msra.mxu0 %v1657_v0  ;;  %v1641_v57 = vor.u32 %v1916_v54, %v1638_v55  ;;  %v1949_v0 = vld [vmem:[%s2733_s7 + $0x110] sm:$0xf0] }
  0xd5   :  { %1114 = vmatpush.bf16.msra.mxu1 %v1661_v2  ;;  %v1728_v2 = vld [vmem:[%s2733_s7 + $0xb8] sm:$0xf] }
  0xd6   :  { %1128 = vmatpush.bf16.msra.mxu3 %v1665_v3  ;;  %1140 = vmatpush.bf16.msrb.mxu2 %v1725_v21  ;;  %v1941_v3 = vld [vmem:[%s2733_s7 + $0xd0] sm:$0xf0]  ;;  %v1927_v21 = vld [vmem:[%s2733_s7 + $0x60] sm:$0xf0] }
  0xd7   :  { %1101 = vmatpush.bf16.msra.mxu0 %v1629_v12  ;;  %v1729_v5 = vor.u32 %v1941_v3, %v1728_v2  ;;  %v1934_v12 = vld [vmem:[%s2733_s7 + $0x98] sm:$0xf0] }
  0xd9   :  { %1115 = vmatpush.bf16.msra.mxu1 %v1633_v15  ;;  %v1702_v15 = vld [vmem:[%s2733_s7 + $0x9c] sm:$0xf0] }
  0xda   :  { %1129 = vmatpush.bf16.msra.mxu3 %v1637_v16  ;;  %1141 = vmatpush.bf16.msrb.mxu2 %v1697_v33  ;;  %v1708_v16 = vld [vmem:[%s2733_s7 + $0x88] sm:$0xf]  ;;  %v1652_v33 = vld [vmem:[%s2733_s7 + $0x18] sm:$0xf] }
  0xdb   :  { %1150 = vmatpush.bf16.msrb.mxu0 %v1841_v25  ;;  %v1928_v25 = vld [vmem:[%s2733_s7 + $0x68] sm:$0xf0] }
  0xdc   :  { %v1681_v28 = vor.u32 %v1928_v25, %v1680_v24 }
  0xdd   :  { %1164 = vmatpush.bf16.msrb.mxu1 %v1845_v26  ;;  %v1673_v26 = vor.u32 %v1927_v21, %v1672_v20 }
  0xde   :  { %1178 = vmatpush.bf16.msrb.mxu3 %v1849_v29  ;;  %1142 = vmatpush.bf16.msrb.mxu2 %v1669_v45  ;;  %v1644_v29 = vld [vmem:[%s2733_s7 + $0x10] sm:$0xf] }
  0xdf   :  { %1151 = vmatpush.bf16.msrb.mxu0 %v1813_v37  ;;  %v1645_v35 = vor.u32 %v1920_v30, %v1644_v29  ;;  %v1653_v37 = vor.u32 %v1921_v34, %v1652_v33 }
  0xe1   :  { %1165 = vmatpush.bf16.msrb.mxu1 %v1817_v38 }
  0xe2   :  { %1179 = vmatpush.bf16.msrb.mxu3 %v1821_v41  ;;  %1143 = vmatpush.bf16.msrb.mxu2 %v1641_v57 }
  0xe5   :  { %1166 = vmatpush.bf16.msrb.mxu1 %v1789_v50 }
  0xe9   :  { %1167 = vmatpush.bf16.msrb.mxu1 %v1761_v62 }
 0x154   :  { %v633_v49 = vpop.f32.mrf.mxu3 }
 0x155   :  { %v634_v1 = vadd.f32 %v1973_v53, %v633_v49  ;;  %v1785_v49 = vor.u32 %v1955_v46, %v1784_v44  ;;  %v2671_v46 = vld [vmem:[%s2734_s8] sm:$0x7f] }
 0x156   :  { %v792_v47 = vperm.slane %v2671_v46, 0  ;;  %v793_v48 = vperm.slane %v2671_v46, 1  ;;  %v794_v54 = vperm.slane %v2671_v46, 2  ;;  %v795_v55 = vperm.slane %v2671_v46, 3 }
 0x157   :  { %v638_v13 = vmax.f32 %v634_v1, 0.0  ;;  %1152 = vmatpush.bf16.msrb.mxu0 %v1785_v49  ;;  %v1765_v1 = vor.u32 %v1949_v0, %v1764_v63  ;;  %v798_v33 = vperm.slane %v2671_v46, 6 }
 0x15b   :  { %1153 = vmatpush.bf16.msrb.mxu0 %v1757_v61 }
 0x15c   :  { %v635_v6 = vpop.f32.mrf.mxu3 }
 0x15d   :  { %v636_v9 = vadd.f32 %v1973_v53, %v635_v6  ;;  %v1793_v53 = vor.u32 %v1956_v52, %v1792_v51  ;;  %v1730_v6 = vld [vmem:[%s2733_s7 + $0xd4] sm:$0xf0] }
 0x15f   :  { %v639_v14 = vmax.f32 %v636_v9, 0.0  ;;  %1180 = vmatpush.bf16.msrb.mxu3 %v1793_v53  ;;  %v1733_v9 = vor.u32 %v1938_v4, %v1730_v6  ;;  %1154 = vmatpush.bf16.msrb.mxu0 %v1729_v5 }
 0x161   :  { %v640_v17 = vpack.c.bf16 %v639_v14, %v638_v13  ;;  %v1931_v13 = vld [vmem:[%s2733_s7 + $0x84] sm:$0xf]  ;;  %v1701_v14 = vor.u32 %v1934_v12, %v1700_v11  ;;  %1168 = vmatpush.bf16.msrb.mxu1 %v1733_v9  ;;  %v796_v9 = vperm.slane %v2671_v46, 4 }
 0x162   :  { %v1705_v18 = vor.u32 %v1931_v13, %v1702_v15 }
 0x163   :  { %717 = vmatmul.bf16.vlgmr.msra.gmra.mxu2 %v640_v17  ;;  %1181 = vmatpush.bf16.msrb.mxu3 %v1765_v1  ;;  %v1935_v17 = vld [vmem:[%s2733_s7 + $0xa0] sm:$0xf0] }
 0x164   :  { %v1709_v19 = vor.u32 %v1935_v17, %v1708_v16  ;;  %1155 = vmatpush.bf16.msrb.mxu0 %v1701_v14 }
 0x165   :  { %1169 = vmatpush.bf16.msrb.mxu1 %v1705_v18 }
 0x167   :  { %1182 = vmatpush.bf16.msrb.mxu3 %v1737_v10  ;;  %v797_v10 = vperm.slane %v2671_v46, 5 }
 0x168   :  { %1156 = vmatpush.bf16.msrb.mxu0 %v1673_v26 }
 0x169   :  { %1170 = vmatpush.bf16.msrb.mxu1 %v1677_v27 }
 0x16b   :  { %1183 = vmatpush.bf16.msrb.mxu3 %v1709_v19 }
 0x16c   :  { %1157 = vmatpush.bf16.msrb.mxu0 %v1645_v35 }
 0x16d   :  { %1171 = vmatpush.bf16.msrb.mxu1 %v1649_v36 }
 0x16f   :  { %1184 = vmatpush.bf16.msrb.mxu3 %v1681_v28 }
 0x173   :  { %1185 = vmatpush.bf16.msrb.mxu3 %v1653_v37 }
 0x1e6   :  { %v718_v38 = vpop.f32.mrf.mxu2 }
 0x1e7   :  { %v719_v40 = vadd.f32 %v1974_v39, %v718_v38 }
 0x1e9   :  { %v723_v43 = vmax.f32 %v719_v40, 0.0 }
 0x1ee   :  { %v720_v41 = vpop.f32.mrf.mxu2 }
 0x1ef   :  { %v721_v42 = vadd.f32 %v1974_v39, %v720_v41 }
 0x1f1   :  { %v724_v44 = vmax.f32 %v721_v42, 0.0 }
 0x1f3   :  { %v725_v45 = vpack.c.bf16 %v724_v44, %v723_v43 }
 0x1f5   :  { %1102 = vmatmul.bf16.vlgmr.msra.gmra.mxu0 %v725_v45  ;;  %1116 = vmatmul.bf16.vlgmr.msra.gmra.mxu1 %v725_v45 }
 0x1f6   :  { %1130 = vmatmul.bf16.vlgmr.msra.gmra.mxu3 %v725_v45  ;;  %1144 = vmatmul.bf16.vlgmr.msrb.gmra.mxu2 %v725_v45 }
 0x205   :  { %1158 = vmatmul.bf16.vlgmr.msrb.gmra.mxu0 %v725_v45  ;;  %1172 = vmatmul.bf16.vlgmr.msrb.gmra.mxu1 %v725_v45 }
 0x206   :  { %1186 = vmatmul.bf16.vlgmr.msrb.gmra.mxu3 %v725_v45 }
 0x272   :  { %v1103_v49 = vpop.f32.mrf.mxu0  ;;  %v1117_v50 = vpop.f32.mrf.mxu1 }
 0x273   :  { %v1104_v51 = vadd.f32 %v1103_v49, %v792_v47  ;;  %v1118_v52 = vadd.f32 %v1117_v50, %v793_v48 }
 0x275   :  { %v1192_v53 = vpack.c.bf16 %v1118_v52, %v1104_v51 }
 0x277   :  { %v1200_v56 = vxor.u32 2147516416, %v1192_v53 }
 0x279   :  { %v1208_v57 = vunpack.c.l.bf16 %v1200_v56  ;;  %v1209_v58 = vunpack.c.h.bf16 %v1200_v56  ;;  %v1131_v59 = vpop.f32.mrf.mxu3  ;;  %v1145_v60 = vpop.f32.mrf.mxu2 }
 0x27a   :  { %v1132_v61 = vadd.f32 %v1131_v59, %v794_v54  ;;  %v1146_v62 = vadd.f32 %v1145_v60, %v795_v55  ;;  %v1105_v63 = vpop.f32.mrf.mxu0  ;;  %v1119_v0 = vpop.f32.mrf.mxu1 }
 0x27b   :  { %v1222_v1 = vmul.f32 1.442695, %v1208_v57  ;;  %v1224_v2 = vmul.f32 1.442695, %v1209_v58  ;;  %v1106_v3 = vadd.f32 %v1105_v63, %v792_v47  ;;  %v1120_v4 = vadd.f32 %v1119_v0, %v793_v48 }
 0x27c   :  { %v1193_v5 = vpack.c.bf16 %v1146_v62, %v1132_v61 }
 0x27d   :  { %1975 = vpow2.f32 %v1222_v1  ;;  %v1196_v6 = vpack.c.bf16 %v1120_v4, %v1106_v3 }
 0x27e   :  { %1977 = vpow2.f32 %v1224_v2  ;;  %v1201_v7 = vxor.u32 2147516416, %v1193_v5 }
 0x27f   :  { %v1204_v8 = vxor.u32 2147516416, %v1196_v6  ;;  %v2035_v6 = vmov 1065369472  }
 0x280   :  { %v1210_v11 = vunpack.c.l.bf16 %v1201_v7  ;;  %v1211_v12 = vunpack.c.h.bf16 %v1201_v7  ;;  %v2680_v7 = vunpack.c.h.bf16 %v2035_v6 }
 0x281   :  { %v1215_v13 = vunpack.c.l.bf16 %v1204_v8  ;;  %v1216_v14 = vunpack.c.h.bf16 %v1204_v8  ;;  %v1133_v15 = vpop.f32.mrf.mxu3  ;;  %v1147_v16 = vpop.f32.mrf.mxu2 }
 0x282   :  { %v1226_v17 = vmul.f32 1.442695, %v1210_v11  ;;  %v1228_v18 = vmul.f32 1.442695, %v1211_v12  ;;  %v1134_v19 = vadd.f32 %v1133_v15, %v794_v54  ;;  %v1148_v20 = vadd.f32 %v1147_v16, %v795_v55  ;;  %v1159_v21 = vpop.f32.mrf.mxu0  ;;  %v1173_v22 = vpop.f32.mrf.mxu1 }
 0x283   :  { %v1976_v23 = vpop.eup %1975  ;;  %v1236_v24 = vmul.f32 1.442695, %v1215_v13  ;;  %v1238_v25 = vmul.f32 1.442695, %v1216_v14  ;;  %v1160_v26 = vadd.f32 %v1159_v21, %v796_v9  ;;  %v1174_v27 = vadd.f32 %v1173_v22, %v797_v10 }
 0x284   :  { %v1978_v28 = vpop.eup %1977  ;;  %1979 = vpow2.f32 %v1226_v17  ;;  %v1197_v29 = vpack.c.bf16 %v1148_v20, %v1134_v19  ;;  %v2682_v17 = vunpack.c.l.bf16 %v2035_v6 }
 0x285   :  { %v1250_v30 = vpack.c.bf16 %v1978_v28, %v1976_v23  ;;  %1981 = vpow2.f32 %v1228_v18  ;;  %v1194_v31 = vpack.c.bf16 %v1174_v27, %v1160_v26 }
 0x286   :  { %1983 = vpow2.f32 %v1236_v24  ;;  %v1205_v32 = vxor.u32 2147516416, %v1197_v29 }
 0x287   :  { %v1258_v34 = vunpack.c.l.bf16 %v1250_v30  ;;  %v1259_v35 = vunpack.c.h.bf16 %v1250_v30  ;;  %1985 = vpow2.f32 %v1238_v25  ;;  %v1202_v36 = vxor.u32 2147516416, %v1194_v31 }
 0x288   :  { %v1217_v37 = vunpack.c.l.bf16 %v1205_v32  ;;  %v1218_v38 = vunpack.c.h.bf16 %v1205_v32 }
 0x289   :  { %v1272_v39 = vadd.f32 1.0, %v1258_v34  ;;  %v1273_v40 = vadd.f32 1.0, %v1259_v35  ;;  %v1212_v41 = vunpack.c.l.bf16 %v1202_v36  ;;  %v1213_v42 = vunpack.c.h.bf16 %v1202_v36  ;;  %v1187_v43 = vpop.f32.mrf.mxu3 }
 0x28a   :  { %v1980_v44 = vpop.eup %1979  ;;  %v1240_v45 = vmul.f32 1.442695, %v1217_v37  ;;  %v1242_v47 = vmul.f32 1.442695, %v1218_v38  ;;  %v1188_v48 = vadd.f32 %v1187_v43, %v798_v33  ;;  %v1161_v49 = vpop.f32.mrf.mxu0 }
 0x28b   :  { %v1175_v50 = vpop.f32.mrf.mxu1  ;;  %v1982_v51 = vpop.eup %1981  ;;  %v1286_v52 = vpack.c.bf16 %v1273_v40, %v1272_v39  ;;  %v1230_v46 = vmul.f32 1.442695, %v1212_v41  ;;  %v1162_v53 = vadd.f32 %v1161_v49, %v796_v9  ;;  %v1232_v61 = vmul.f32 1.442695, %v1213_v42 }
 0x28c   :  { %v1984_v54 = vpop.eup %1983  ;;  %v1251_v55 = vpack.c.bf16 %v1982_v51, %v1980_v44  ;;  %1987 = vpow2.f32 %v1240_v45  ;;  %v1195_v56 = vpack.c.bf16 %v1188_v48, %v1188_v48  ;;  %v1176_v57 = vadd.f32 %v1175_v50, %v797_v10 }
 0x28d   :  { %v1986_v58 = vpop.eup %1985  ;;  %v1296_v59 = vunpack.c.h.bf16 %v1286_v52  ;;  %v1297_v60 = vunpack.c.l.bf16 %v1286_v52  ;;  %1989 = vpow2.f32 %v1242_v47 }
 0x28e   :  { %v1260_v62 = vunpack.c.l.bf16 %v1251_v55  ;;  %v1261_v63 = vunpack.c.h.bf16 %v1251_v55  ;;  %v1254_v0 = vpack.c.bf16 %v1986_v58, %v1984_v54  ;;  %1991 = vpow2.f32 %v1230_v46 }
 0x28f   :  { %1993 = vrcp.f32 %v1296_v59  ;;  %v1203_v1 = vxor.u32 2147516416, %v1195_v56  ;;  %v1198_v2 = vpack.c.bf16 %v1176_v57, %v1162_v53 }
 0x290   :  { %1995 = vrcp.f32 %v1297_v60  ;;  %v1274_v3 = vadd.f32 1.0, %v1260_v62  ;;  %v1275_v4 = vadd.f32 1.0, %v1261_v63  ;;  %v1265_v5 = vunpack.c.l.bf16 %v1254_v0 }
 0x291   :  { %v1266_v8 = vunpack.c.h.bf16 %v1254_v0  ;;  %1997 = vpow2.f32 %v1232_v61  ;;  %v1214_v9 = vunpack.c.l.bf16 %v1203_v1  ;;  %v1189_v10 = vpop.f32.mrf.mxu3  ;;  %v1206_v14 = vxor.u32 2147516416, %v1198_v2 }
 0x292   :  { %v1988_v11 = vpop.eup %1987  ;;  %v1287_v12 = vpack.c.bf16 %v1275_v4, %v1274_v3  ;;  %v1279_v13 = vadd.f32 1.0, %v1265_v5  ;;  %v1190_v15 = vadd.f32 %v1189_v10, %v798_v33 }
 0x293   :  { %v1990_v16 = vpop.eup %1989  ;;  %v1280_v18 = vadd.f32 1.0, %v1266_v8  ;;  %v1234_v19 = vmul.f32 1.442695, %v1214_v9  ;;  %v1219_v24 = vunpack.c.l.bf16 %v1206_v14  ;;  %v1220_v27 = vunpack.c.h.bf16 %v1206_v14 }
 0x294   :  { %v1992_v20 = vpop.eup %1991  ;;  %v1303_v21 = vunpack.c.h.bf16 %v1287_v12  ;;  %v1304_v22 = vunpack.c.l.bf16 %v1287_v12  ;;  %v1255_v23 = vpack.c.bf16 %v1990_v16, %v1988_v11  ;;  %v1199_v28 = vpack.c.bf16 %v1190_v15, %v1190_v15 }
 0x295   :  { %v1994_v25 = vpop.eup %1993  ;;  %v1290_v26 = vpack.c.bf16 %v1280_v18, %v1279_v13  ;;  %1999 = vpow2.f32 %v1234_v19  ;;  %v1244_v40 = vmul.f32 1.442695, %v1219_v24  ;;  %v1246_v42 = vmul.f32 1.442695, %v1220_v27 }
 0x296   :  { %v1996_v29 = vpop.eup %1995  ;;  %v1299_v30 = vmul.f32 %v1994_v25, %v2680_v7  ;;  %2001 = vrcp.f32 %v1303_v21  ;;  %v1267_v31 = vunpack.c.l.bf16 %v1255_v23  ;;  %v1268_v32 = vunpack.c.h.bf16 %v1255_v23 }
 0x297   :  { %v1998_v33 = vpop.eup %1997  ;;  %v1301_v34 = vmul.f32 %v1996_v29, %v2682_v17  ;;  %2003 = vrcp.f32 %v1304_v22  ;;  %v1324_v35 = vunpack.c.h.bf16 %v1290_v26  ;;  %v1325_v36 = vunpack.c.l.bf16 %v1290_v26 }
 0x298   :  { %v1281_v37 = vadd.f32 1.0, %v1267_v31  ;;  %v1282_v38 = vadd.f32 1.0, %v1268_v32  ;;  %v1252_v39 = vpack.c.bf16 %v1998_v33, %v1992_v20  ;;  %v1207_v43 = vxor.u32 2147516416, %v1199_v28 }
 0x299   :  { %v1302_v41 = vpack.c.bf16 %v1299_v30, %v1301_v34  ;;  %2005 = vrcp.f32 %v1324_v35 }
 0x29a   :  { %2007 = vrcp.f32 %v1325_v36  ;;  %v1291_v44 = vpack.c.bf16 %v1282_v38, %v1281_v37  ;;  %v1262_v45 = vunpack.c.l.bf16 %v1252_v39  ;;  %v1263_v47 = vunpack.c.h.bf16 %v1252_v39 }
 0x29b   :  { %v2000_v48 = vpop.eup %1999  ;;  %1352 = vst [vmem:[%s2735_s9] sm:$0xff] %v1302_v41  ;;  %2009 = vpow2.f32 %v1244_v40  ;;  %v1221_v49 = vunpack.c.l.bf16 %v1207_v43 }
 0x29c   :  { %v2002_v50 = vpop.eup %2001  ;;  %v1331_v51 = vunpack.c.h.bf16 %v1291_v44  ;;  %v1332_v52 = vunpack.c.l.bf16 %v1291_v44  ;;  %v1276_v46 = vadd.f32 1.0, %v1262_v45  ;;  %v1277_v53 = vadd.f32 1.0, %v1263_v47 }
 0x29d   :  { %v2004_v54 = vpop.eup %2003  ;;  %v1306_v55 = vmul.f32 %v2002_v50, %v2680_v7  ;;  %v1253_v56 = vpack.c.bf16 %v2000_v48, %v2000_v48  ;;  %2011 = vpow2.f32 %v1246_v42  ;;  %v1248_v57 = vmul.f32 1.442695, %v1221_v49 }
 0x29e   :  { %v1308_v58 = vmul.f32 %v2004_v54, %v2682_v17  ;;  %2013 = vrcp.f32 %v1331_v51  ;;  %v1288_v59 = vpack.c.bf16 %v1277_v53, %v1276_v46 }
 0x29f   :  { %v2006_v60 = vpop.eup %2005  ;;  %2015 = vrcp.f32 %v1332_v52  ;;  %v1264_v61 = vunpack.c.l.bf16 %v1253_v56 }
 0x2a0   :  { %v2008_v62 = vpop.eup %2007  ;;  %v1309_v63 = vpack.c.bf16 %v1306_v55, %v1308_v58  ;;  %v1327_v0 = vmul.f32 %v2006_v60, %v2680_v7  ;;  %v1310_v1 = vunpack.c.h.bf16 %v1288_v59  ;;  %v1311_v2 = vunpack.c.l.bf16 %v1288_v59 }
 0x2a1   :  { %v2010_v3 = vpop.eup %2009  ;;  %v1329_v4 = vmul.f32 %v2008_v62, %v2682_v17  ;;  %v1278_v5 = vadd.f32 1.0, %v1264_v61  ;;  %2017 = vpow2.f32 %v1248_v57 }
 0x2a2   :  { %1353 = vst [vmem:[%s2735_s9 + $0x8] sm:$0xff] %v1309_v63  ;;  %2019 = vrcp.f32 %v1310_v1 }
 0x2a3   :  { %v2012_v6 = vpop.eup %2011  ;;  %v1330_v8 = vpack.c.bf16 %v1327_v0, %v1329_v4  ;;  %2021 = vrcp.f32 %v1311_v2  ;;  %v1289_v9 = vpack.c.bf16 %v1278_v5, %v1278_v5 }
 0x2a4   :  { %v2014_v10 = vpop.eup %2013  ;;  %v1256_v11 = vpack.c.bf16 %v2012_v6, %v2010_v3 }
 0x2a5   :  { %v2016_v12 = vpop.eup %2015  ;;  %1357 = vst [vmem:[%s2735_s9 + $0x1c] sm:$0xff] %v1330_v8  ;;  %v1334_v13 = vmul.f32 %v2014_v10, %v2680_v7  ;;  %v1317_v14 = vunpack.c.h.bf16 %v1289_v9  ;;  %v1318_v15 = vunpack.c.l.bf16 %v1289_v9 }
 0x2a6   :  { %v1336_v16 = vmul.f32 %v2016_v12, %v2682_v17  ;;  %v1269_v18 = vunpack.c.l.bf16 %v1256_v11  ;;  %v1270_v19 = vunpack.c.h.bf16 %v1256_v11 }
 0x2a7   :  { %v2018_v20 = vpop.eup %2017  ;;  %2023 = vrcp.f32 %v1317_v14 }
 0x2a8   :  { %v2020_v21 = vpop.eup %2019  ;;  %v1337_v22 = vpack.c.bf16 %v1334_v13, %v1336_v16  ;;  %2025 = vrcp.f32 %v1318_v15  ;;  %v1283_v23 = vadd.f32 1.0, %v1269_v18  ;;  %v1284_v24 = vadd.f32 1.0, %v1270_v19 }
 0x2a9   :  { %v2022_v25 = vpop.eup %2021  ;;  %v1313_v26 = vmul.f32 %v2020_v21, %v2680_v7  ;;  %v1257_v27 = vpack.c.bf16 %v2018_v20, %v2018_v20 }
 0x2aa   :  { %1358 = vst [vmem:[%s2735_s9 + $0x24] sm:$0xff] %v1337_v22  ;;  %v1315_v28 = vmul.f32 %v2022_v25, %v2682_v17  ;;  %v1292_v29 = vpack.c.bf16 %v1284_v24, %v1283_v23 }
 0x2ab   :  { %v1271_v30 = vunpack.c.l.bf16 %v1257_v27 }
 0x2ac   :  { %v1316_v31 = vpack.c.bf16 %v1313_v26, %v1315_v28  ;;  %v1338_v32 = vunpack.c.h.bf16 %v1292_v29  ;;  %v1339_v33 = vunpack.c.l.bf16 %v1292_v29 }
 0x2ad   :  { %v2024_v34 = vpop.eup %2023  ;;  %v1285_v35 = vadd.f32 1.0, %v1271_v30 }
 0x2ae   :  { %v2026_v36 = vpop.eup %2025  ;;  %1354 = vst [vmem:[%s2735_s9 + $0x10] sm:$0xff] %v1316_v31  ;;  %v1320_v37 = vmul.f32 %v2024_v34, %v2680_v7  ;;  %2027 = vrcp.f32 %v1338_v32 }
 0x2af   :  { %v1322_v38 = vmul.f32 %v2026_v36, %v2682_v17  ;;  %2029 = vrcp.f32 %v1339_v33  ;;  %v1293_v39 = vpack.c.bf16 %v1285_v35, %v1285_v35 }
 0x2b1   :  { %v1323_v40 = vpack.c.bf16 %v1320_v37, %v1322_v38  ;;  %v1345_v41 = vunpack.c.h.bf16 %v1293_v39  ;;  %v1346_v42 = vunpack.c.l.bf16 %v1293_v39 }
 0x2b3   :  { %1356 = vst.msk [vmem:[%s2735_s9 + $0x18] sm:$0xf] %vm1355_vm1, %v1323_v40  ;;  %2031 = vrcp.f32 %v1345_v41 }
 0x2b4   :  { %v2028_v43 = vpop.eup %2027  ;;  %2033 = vrcp.f32 %v1346_v42 }
 0x2b5   :  { %v2030_v44 = vpop.eup %2029  ;;  %v1341_v45 = vmul.f32 %v2028_v43, %v2680_v7 }
 0x2b6   :  { %v1343_v47 = vmul.f32 %v2030_v44, %v2682_v17 }
 0x2b8   :  { %v1344_v48 = vpack.c.bf16 %v1341_v45, %v1343_v47 }
 0x2b9   :  { %v2032_v49 = vpop.eup %2031 }
 0x2ba   :  { %v2034_v50 = vpop.eup %2033  ;;  %1359 = vst [vmem:[%s2735_s9 + $0x2c] sm:$0xff] %v1344_v48  ;;  %v1348_v51 = vmul.f32 %v2032_v49, %v2680_v7 }
 0x2bb   :  { %v1350_v52 = vmul.f32 %v2034_v50, %v2682_v17 }
 0x2bd   :  { %v1351_v46 = vpack.c.bf16 %v1348_v51, %v1350_v52 }
 0x2bf   :  { %1360 = vst.msk [vmem:[%s2735_s9 + $0x34] sm:$0xf] %vm1355_vm1, %v1351_v46 }

</bundles_post_ra>
